<compile_context>
chip_gen: v6e
topology: v6e:2x2x1
jax: 0.10.0
libtpu: 0.0.40
codegen_flags: <defaults>
</compile_context>

<pallas_src>
import jax
import jax.numpy as jnp
from jax.experimental import pallas as pl
from jax.experimental.pallas import tpu as pltpu


def _round_up(v, m):
    return pl.cdiv(v, m) * m


def mlp_kernel(x_ref, w1_ref, b1_ref, w2_ref, b2_ref, out_ref):
    # dropout #1: eval-mode identity.
    # TODO(synk): training-mode dropout (pltpu.prng_* mask) not implemented.

    # Cast the f32 input tile to bf16 on-chip (VPU) instead of materializing a padded
    # bf16 copy of x in HBM (removes an entire extra read+write pass over activations).
    x = x_ref[...].astype(jnp.bfloat16)

    # layer 1: x @ W1 + b1, ReLU  (bf16 MXU operands, f32 accumulation / epilogue)
    h = jnp.dot(x, w1_ref[...], preferred_element_type=jnp.float32)
    h = jnp.maximum(h + b1_ref[...], 0.0)

    # dropout #2: eval-mode identity.

    # layer 2: h @ W2 + b2
    z = jnp.dot(h.astype(jnp.bfloat16), w2_ref[...],
                preferred_element_type=jnp.float32) + b2_ref[...]

    # log_softmax over dim=1 in f32; C is the true class count (no padded lanes to mask).
    zmax = jnp.max(z, axis=1, keepdims=True)
    zs = z - zmax
    lse = jnp.log(jnp.sum(jnp.exp(zs), axis=1, keepdims=True))
    out_ref[...] = (zs - lse).astype(out_ref.dtype)


# Stay comfortably under v7x's 64 MiB per-TC VMEM (v5e/v6e have 128 MiB).
_VMEM_CAP = 48 << 20


def _vmem_budget(tm, f, h, c):
    x_tile = tm * f * 4 * 2                 # f32 input tile, double-buffered
    out_tile = tm * c * 4 * 2               # f32 output tile, double-buffered
    weights = (f * h + h * c) * 2 * 2       # bf16 W1/W2 (conservatively double-buffered)
    biases = (h + c) * 4 * 2
    interm = tm * h * (4 + 2) + tm * c * 4 * 4  # f32 h, bf16 h copy, softmax temps
    return x_tile + out_tile + weights + biases + interm + (2 << 20)


def mlp_forward(x, w1, b1, w2, b2, *, tm=None):
    """x: (N, F) f32; w1: (F, H); b1: (H,); w2: (H, C); b2: (C,). Returns (N, C) f32 log-probs."""
    n, f = x.shape
    h_dim = w1.shape[1]
    c = w2.shape[1]

    # Weight prep: bf16 matmul operands (halves weight HBM/VMEM traffic, MXU-native);
    # biases stay f32 for the f32 epilogue. For repeated inference, pre-cast the weights
    # once at model-load time and pass bf16 in -- then this is a no-op per call.
    w1_b = w1 if w1.dtype == jnp.bfloat16 else w1.astype(jnp.bfloat16)
    w2_b = w2 if w2.dtype == jnp.bfloat16 else w2.astype(jnp.bfloat16)
    b1_2d = b1.reshape(1, -1).astype(jnp.float32)
    b2_2d = b2.reshape(1, -1).astype(jnp.float32)

    # Row tile: large tiles amortize per-grid-step overhead (mem-bound kernel). For
    # mid-size N force >= 2 grid steps so both TensorCores on v7x get work; shrink tm
    # if the explicit VMEM budget would exceed the per-TC cap.
    if tm is None:
        if n >= 1024:
            tm = 512
        else:
            tm = max(8, _round_up(pl.cdiv(n, 2), 8))
    tm = max(8, _round_up(tm, 8))
    while _vmem_budget(tm, f, h_dim, c) > _VMEM_CAP and tm > 8:
        tm = max(8, _round_up(tm // 2, 8))
    # TODO(synk): if weights alone exceed VMEM (very large F/H), add a reduction grid
    # axis over F ("arbitrary", f32 accumulator scratch + pl.when init/finalize).

    grid = (pl.cdiv(n, tm),)  # ragged last block: out-of-bounds rows are masked on store

    cost = pl.CostEstimate(
        flops=2 * n * f * h_dim + 2 * n * h_dim * c,
        transcendentals=n * (c + 1),
        bytes_accessed=(n * f * 4 + (f * h_dim + h_dim * c) * 2
                        + (h_dim + c) * 4 + n * c * 4),
    )

    vmem_bytes = min(_VMEM_CAP, max(_vmem_budget(tm, f, h_dim, c), 8 << 20))

    return pl.pallas_call(
        mlp_kernel,
        out_shape=jax.ShapeDtypeStruct((n, c), jnp.float32),
        grid_spec=pltpu.PrefetchScalarGridSpec(
            num_scalar_prefetch=0,
            grid=grid,
            in_specs=[
                pl.BlockSpec((tm, f), lambda i: (i, 0)),       # x row tile (streamed, f32)
                pl.BlockSpec((f, h_dim), lambda i: (0, 0)),    # W1 (resident)
                pl.BlockSpec((1, h_dim), lambda i: (0, 0)),    # b1
                pl.BlockSpec((h_dim, c), lambda i: (0, 0)),    # W2 (resident)
                pl.BlockSpec((1, c), lambda i: (0, 0)),        # b2
            ],
            out_specs=pl.BlockSpec((tm, c), lambda i: (i, 0)),  # unpadded (N, C) output
        ),
        compiler_params=pltpu.CompilerParams(
            dimension_semantics=("parallel",),   # row tiles shard across TCs on v7x
            vmem_limit_bytes=vmem_bytes,
        ),
        cost_estimate=cost,
    )(x, w1_b, b1_2d, w2_b, b2_2d)


if __name__ == "__main__":
    # small synthetic "dataset": N nodes, F features, H hidden, C classes
    N, F, H, C = 64, 16, 32, 4

    key = jax.random.PRNGKey(0)
    kx, kw1, kb1, kw2, kb2 = jax.random.split(key, 5)

    x = jax.random.normal(kx, (N, F), jnp.float32)

    # torch.nn.Linear-style init (uniform in +/- 1/sqrt(fan_in)); stored as (in, out)
    lim1 = 1.0 / jnp.sqrt(F)
    w1 = jax.random.uniform(kw1, (F, H), jnp.float32, -lim1, lim1)
    b1 = jax.random.uniform(kb1, (H,), jnp.float32, -lim1, lim1)
    lim2 = 1.0 / jnp.sqrt(H)
    w2 = jax.random.uniform(kw2, (H, C), jnp.float32, -lim2, lim2)
    b2 = jax.random.uniform(kb2, (C,), jnp.float32, -lim2, lim2)

    out = jax.block_until_ready(mlp_forward(x, w1, b1, w2, b2))

    # sanity: rows sum (in prob space) to 1, and match a pure-JAX reference
    assert out.shape == (N, C)
    assert bool(jnp.all(jnp.abs(jnp.sum(jnp.exp(out), axis=1) - 1.0) < 1e-3))

    h_ref = jnp.maximum(x @ w1 + b1, 0.0)
    z_ref = h_ref @ w2 + b2
    ref = jax.nn.log_softmax(z_ref, axis=1)
    assert bool(jnp.max(jnp.abs(out - ref)) < 5e-2)  # bf16 matmul tolerance

    print("KERNEL_OK")
</pallas_src>

<mosaic_0001>
module attributes {stable_mosaic.version = 11 : i64} {
  func.func @mlp_kernel(%arg0: i32, %arg1: memref<32x16xf32, #tpu.memory_space<vmem>>, %arg2: memref<16x32xbf16, #tpu.memory_space<vmem>>, %arg3: memref<1x32xf32, #tpu.memory_space<vmem>>, %arg4: memref<32x4xbf16, #tpu.memory_space<vmem>>, %arg5: memref<1x4xf32, #tpu.memory_space<vmem>>, %arg6: memref<32x4xf32, #tpu.memory_space<vmem>>) attributes {dimension_semantics = [#tpu.dimension_semantics<parallel>], iteration_bounds = array<i64: 2>, scalar_prefetch = 0 : i64, scratch_operands = 0 : i64, tpu.core_type = #tpu.core_type<tc>, window_params = [{transform_indices = @transform_0, window_bounds = array<i64: 32, 16>}, {pipeline_mode = #tpu.pipeline_mode<synchronous>, transform_indices = @transform_1, window_bounds = array<i64: 16, 32>}, {pipeline_mode = #tpu.pipeline_mode<synchronous>, transform_indices = @transform_2, window_bounds = array<i64: 1, 32>}, {pipeline_mode = #tpu.pipeline_mode<synchronous>, transform_indices = @transform_3, window_bounds = array<i64: 32, 4>}, {pipeline_mode = #tpu.pipeline_mode<synchronous>, transform_indices = @transform_4, window_bounds = array<i64: 1, 4>}, {transform_indices = @transform_5, window_bounds = array<i64: 32, 4>}]} {
    %c0 = arith.constant 0 : index
    %c0_0 = arith.constant 0 : index
    %0 = vector.load %arg1[%c0, %c0_0] : memref<32x16xf32, #tpu.memory_space<vmem>>, vector<32x16xf32>
    %1 = arith.truncf %0 : vector<32x16xf32> to vector<32x16xbf16>
    %c0_1 = arith.constant 0 : index
    %c0_2 = arith.constant 0 : index
    %2 = vector.load %arg2[%c0_1, %c0_2] : memref<16x32xbf16, #tpu.memory_space<vmem>>, vector<16x32xbf16>
    %cst = arith.constant dense<0.000000e+00> : vector<32x32xf32>
    %3 = tpu.matmul %1, %2, %cst {dimension_numbers = #tpu.dot_dimension_numbers<[1], [0], [0], [1], [0, 0, 1, 1], [], []>} : vector<32x16xbf16>, vector<16x32xbf16>, vector<32x32xf32> -> vector<32x32xf32>
    %c0_3 = arith.constant 0 : index
    %c0_4 = arith.constant 0 : index
    %4 = vector.load %arg3[%c0_3, %c0_4] : memref<1x32xf32, #tpu.memory_space<vmem>>, vector<1x32xf32>
    %5 = vector.broadcast %4 : vector<1x32xf32> to vector<32x32xf32>
    %6 = arith.addf %3, %5 : vector<32x32xf32>
    %cst_5 = arith.constant 0.000000e+00 : f32
    %7 = vector.broadcast %cst_5 : f32 to vector<32x32xf32>
    %8 = arith.maximumf %6, %7 : vector<32x32xf32>
    %9 = arith.truncf %8 : vector<32x32xf32> to vector<32x32xbf16>
    %c0_6 = arith.constant 0 : index
    %c0_7 = arith.constant 0 : index
    %10 = vector.load %arg4[%c0_6, %c0_7] : memref<32x4xbf16, #tpu.memory_space<vmem>>, vector<32x4xbf16>
    %cst_8 = arith.constant dense<0.000000e+00> : vector<32x4xf32>
    %11 = tpu.matmul %9, %10, %cst_8 {dimension_numbers = #tpu.dot_dimension_numbers<[1], [0], [0], [1], [0, 0, 1, 1], [], []>} : vector<32x32xbf16>, vector<32x4xbf16>, vector<32x4xf32> -> vector<32x4xf32>
    %c0_9 = arith.constant 0 : index
    %c0_10 = arith.constant 0 : index
    %12 = vector.load %arg5[%c0_9, %c0_10] : memref<1x4xf32, #tpu.memory_space<vmem>>, vector<1x4xf32>
    %13 = vector.broadcast %12 : vector<1x4xf32> to vector<32x4xf32>
    %14 = arith.addf %11, %13 : vector<32x4xf32>
    %cst_11 = arith.constant dense<0xFF800000> : vector<32xf32>
    %15 = vector.multi_reduction <maximumf>, %14, %cst_11 [1] : vector<32x4xf32> to vector<32xf32>
    %16 = vector.shape_cast %15 : vector<32xf32> to vector<32x1xf32>
    %17 = vector.broadcast %16 : vector<32x1xf32> to vector<32x4xf32>
    %18 = arith.subf %14, %17 : vector<32x4xf32>
    %19 = math.exp %18 : vector<32x4xf32>
    %cst_12 = arith.constant dense<0.000000e+00> : vector<32xf32>
    %20 = vector.multi_reduction <add>, %19, %cst_12 [1] : vector<32x4xf32> to vector<32xf32>
    %21 = vector.shape_cast %20 : vector<32xf32> to vector<32x1xf32>
    %22 = math.log %21 : vector<32x1xf32>
    %23 = vector.broadcast %22 : vector<32x1xf32> to vector<32x4xf32>
    %24 = arith.subf %18, %23 : vector<32x4xf32>
    %c0_13 = arith.constant 0 : index
    %c0_14 = arith.constant 0 : index
    %25 = vector.load %arg6[%c0_13, %c0_14] : memref<32x4xf32, #tpu.memory_space<vmem>>, vector<32x4xf32>
    tpu.vector_store %arg6[%c0_13, %c0_14], %24 {strides = array<i32>} : memref<32x4xf32, #tpu.memory_space<vmem>>, vector<32x4xf32>,
    return
  }
  func.func @transform_0(%arg0: i32) -> (i32, i32) {
    %c0_i32 = arith.constant 0 : i32
    %c0_i32_0 = arith.constant 0 : i32
    return %arg0, %c0_i32 : i32, i32
  }
  func.func @transform_1(%arg0: i32) -> (i32, i32) {
    %c0_i32 = arith.constant 0 : i32
    %c0_i32_0 = arith.constant 0 : i32
    %c0_i32_1 = arith.constant 0 : i32
    return %c0_i32, %c0_i32_0 : i32, i32
  }
  func.func @transform_2(%arg0: i32) -> (i32, i32) {
    %c0_i32 = arith.constant 0 : i32
    %c0_i32_0 = arith.constant 0 : i32
    %c0_i32_1 = arith.constant 0 : i32
    return %c0_i32, %c0_i32_0 : i32, i32
  }
  func.func @transform_3(%arg0: i32) -> (i32, i32) {
    %c0_i32 = arith.constant 0 : i32
    %c0_i32_0 = arith.constant 0 : i32
    %c0_i32_1 = arith.constant 0 : i32
    return %c0_i32, %c0_i32_0 : i32, i32
  }
  func.func @transform_4(%arg0: i32) -> (i32, i32) {
    %c0_i32 = arith.constant 0 : i32
    %c0_i32_0 = arith.constant 0 : i32
    %c0_i32_1 = arith.constant 0 : i32
    return %c0_i32, %c0_i32_0 : i32, i32
  }
  func.func @transform_5(%arg0: i32) -> (i32, i32) {
    %c0_i32 = arith.constant 0 : i32
    %c0_i32_0 = arith.constant 0 : i32
    return %arg0, %c0_i32 : i32, i32
  }
}

</mosaic_0001>

<bundles_post_ra>
// kernel: tpu_custom_call.1
= control target key start
LH: loop header
LB: loop body
LE: loop exit
PB: predicated region body
PF: predicated region fallthrough
CT: control target
= control target key end

     0   :  { %s606_s18 = smov 0   ;;  %s657_s0 = inlined_call_operand.vmem [shape: f32[64,16], index: 0, kind: input, shape index: {}]   ;;  %s658_s1 = inlined_call_operand.vmem [shape: bf16[16,32], index: 1, kind: input, shape index: {}]   ;;  %s659_s2 = inlined_call_operand.vmem [shape: f32[1,32], index: 2, kind: input, shape index: {}]   ;;  %s660_s3 = inlined_call_operand.vmem [shape: bf16[32,4], index: 3, kind: input, shape index: {}]   ;;  %s661_s4 = inlined_call_operand.vmem [shape: f32[1,4], index: 4, kind: input, shape index: {}]   ;;  %s662_s5 = inlined_call_operand.vmem [shape: f32[64,4], index: 5, kind: output, shape index: {}]  }
   0x1 LB: > { %s500_s19 = sadd.s32 4294967295, %s574_s18   ;;  %p504_p0 = scmp.ge.s32.totalorder %s574_s18, 1  ;;  %s574_s18 = sphi %s606_s18, %s15_s18  }
   0x2   : > { %p188_p1 = scmp.lt.s32.totalorder %s574_s18, 3 }
   0x4   : > { %p189_p2 = pnand %p504_p0, %p188_p1 }
   0x5   : > { %s505_s22 = sshll.u32 (!%p189_p2), %s500_s19, 2 }
   0x6   : > { %192 = sbr.rel (%p189_p2) target bundleno = 744 (0x2e8), region = 40  ;;  %p217_p3 = scmp.lt.s32.totalorder (!%p189_p2), %s505_s22, 7 }
   0xb   : > { %v549_v0 = vld [vmem:[%s658_s1] sm:$0xff]   ;;  %s664_s22 = smov (!%p217_p3, %s505_s22), 7  ;;  %vm250_vm0 = vcmask 130048   ;;  %v550_v7 = vld [vmem:[%s660_s3 + $0x8] sm:$0xff]   ;;  %vm335_vm1 = vcmask 261120   ;;  %vm391_vm2 = vcmask 31744  }
   0xc   : > { %527 = vmatprep.subr.bf16.mxu0 %v549_v0  ;;  %s506_s23 = sshll.u32 %s664_s22, 3  ;;  %533 = vmatprep.subr.bf16.mxu1 %v550_v7  ;;  %v551_v8 = vld [vmem:[%s660_s3] sm:$0xff]  }
   0xd   : > { %528 = vmatpush3.bf16.msra.mxu0 %v549_v0  ;;  %s220_s26 = scalar_lea.vmem %s657_s0, %s506_s23  ;;  %534 = vmatpush3.bf16.msra.mxu1 %v550_v7  ;;  %v509_v11 = vld [vmem:[%s659_s2] ss:$0 sm:$0xff]  ;;  %s226_s12 = scalar_lea.vmem %s662_s5, %s506_s23 }
   0xe   : > { %v229_v1 = vld [vmem:[%s220_s26] sm:$0xff]  ;;  %v230_v2 = vld [vmem:[%s220_s26 + $0x8] sm:$0xff]  ;;  %v231_v3 = vld [vmem:[%s220_s26 + $0x10] sm:$0xff]  ;;  %535 = vmatprep.subr.bf16.mxu1 %v551_v8 }
   0xf   : > { %v233_v4 = vpack.c.bf16 %v230_v2, %v229_v1  ;;  %v232_v5 = vld [vmem:[%s220_s26 + $0x18] sm:$0xff]  ;;  %v513_v24 = vld [vmem:[%s661_s4] ss:$0 sm:$0xff] }
  0x10   : > { %v234_v6 = vpack.c.bf16 %v232_v5, %v231_v3 }
  0x11   : > { %529 = vmatprep.mubr.msk.bf16.mxu0 %vm250_vm0, %v233_v4  ;;  %536 = vmatpush3.bf16.msra.mxu1 %v551_v8 }
  0x12   : > { %530 = vmatmul.mubr.msk.bf16.vlgmr.msra.gmra.mxu0 %vm250_vm0, %v234_v6 }
  0xd2   : > { %v531_v9 = vpop.f32.mrf.mxu0 }
  0xd3   : > { %v300_v15 = vadd.f32 %v531_v9, %v509_v11 }
  0xd4   : > { %v291_v10 = vpop.f32.mrf.mxu0 }
  0xd5   : > { %v292_v13 = vadd.f32 %v509_v11, %v291_v10  ;;  %v308_v21 = vmax.f32 %v300_v15, 0.0 }
  0xd6   : > { %v532_v12 = vpop.f32.mrf.mxu0 }
  0xd7   : > { %v303_v14 = vadd.f32 %v532_v12, %v509_v11  ;;  %v306_v19 = vmax.f32 %v292_v13, 0.0 }
  0xd8   : > { %v294_v16 = vpop.f32.mrf.mxu0 }
  0xd9   : > { %v295_v17 = vadd.f32 %v509_v11, %v294_v16  ;;  %v309_v18 = vmax.f32 %v303_v14, 0.0 }
  0xdb   : > { %v307_v20 = vmax.f32 %v295_v17, 0.0  ;;  %v311_v23 = vpack.c.bf16 %v309_v18, %v308_v21 }
  0xdd   : > { %v310_v22 = vpack.c.bf16 %v307_v20, %v306_v19 }
  0xdf   : > { %537 = vmatprep.mubr.msk.bf16.mxu1 %vm335_vm1, %v310_v22 }
  0xe0   : > { %538 = vmatmul.mubr.msk.bf16.vlgmr.msra.gmra.mxu1 %vm335_vm1, %v311_v23 }
 0x1a0   : > { %v539_v25 = vpop.f32.mrf.mxu1 }
 0x1a1   : > { %v385_v26 = vadd.f32 %v539_v25, %v513_v24 }
 0x1a2   : > { %v376_v27 = vpop.f32.mrf.mxu1 }
 0x1a3   : > { %v377_v28 = vadd.f32 %v513_v24, %v376_v27  ;;  %v398_v29 = vsel %vm391_vm2, %v385_v26, -inf }
 0x1a4   : > { %399 = vmax.xlane.f32.xlu1 %v398_v29  ;;  %v540_v30 = vpop.f32.mrf.mxu1 }
 0x1a5   : > { %v388_v31 = vadd.f32 %v540_v30, %v513_v24  ;;  %v392_v32 = vsel %vm391_vm2, %v377_v28, -inf }
 0x1a6   : > { %v379_v33 = vpop.f32.mrf.mxu1  ;;  %393 = vmax.xlane.f32.xlu0 %v392_v32 }
 0x1a7   : > { %v380_v34 = vadd.f32 %v513_v24, %v379_v33  ;;  %v401_v35 = vsel %vm391_vm2, %v388_v31, -inf }
 0x1a8   : > { %402 = vmax.xlane.f32.xlu1 %v401_v35 }
 0x1a9   : > { %v395_v36 = vsel %vm391_vm2, %v380_v34, -inf }
 0x1aa   : > { %396 = vmax.xlane.f32.xlu0 %v395_v36 }
 0x22d   : > { %v400_v37 = vpop.xlane.xlu1 %399 }
 0x22e   : > { %v406_v38 = vsub.f32 %v385_v26, %v400_v37 }
 0x22f   : > { %v394_v39 = vpop.xlane.xlu0 %393 }
 0x230   : > { %v404_v40 = vsub.f32 %v377_v28, %v394_v39  ;;  %v412_v42 = vmul.f32 1.442695, %v406_v38 }
 0x231   : > { %v403_v41 = vpop.xlane.xlu1 %402 }
 0x232   : > { %v408_v43 = vmul.f32 1.442695, %v404_v40  ;;  %v407_v44 = vsub.f32 %v388_v31, %v403_v41 }
 0x233   : > { %v397_v45 = vpop.xlane.xlu0 %396 }
 0x234   : > { %552 = vpow2.f32 %v408_v43  ;;  %v405_v46 = vsub.f32 %v380_v34, %v397_v45  ;;  %v414_v47 = vmul.f32 1.442695, %v407_v44 }
 0x235   : > { %554 = vpow2.f32 %v412_v42 }
 0x236   : > { %v410_v48 = vmul.f32 1.442695, %v405_v46 }
 0x238   : > { %556 = vpow2.f32 %v410_v48 }
 0x239   : > { %558 = vpow2.f32 %v414_v47 }
 0x241   : > { %v553_v49 = vpop.eup %552 }
 0x242   : > { %v416_v50 = vsel %vm391_vm2, %v553_v49, 0.0  ;;  %v555_v51 = vpop.eup %554 }
 0x243   : > { %417 = vadd.xlane.f32.xlu0 %v416_v50  ;;  %v422_v53 = vsel %vm391_vm2, %v555_v51, 0.0 }
 0x245   : > { %v557_v52 = vpop.eup %556 }
 0x246   : > { %v419_v54 = vsel %vm391_vm2, %v557_v52, 0.0  ;;  %v559_v55 = vpop.eup %558 }
 0x247   : > { %423 = vadd.xlane.f32.xlu0 %v422_v53  ;;  %420 = vadd.xlane.f32.xlu1 %v419_v54  ;;  %v425_v56 = vsel %vm391_vm2, %v559_v55, 0.0 }
 0x24b   : > { %426 = vadd.xlane.f32.xlu1 %v425_v56 }
 0x2cc   : > { %v418_v57 = vpop.xlane.xlu0 %417 }
 0x2cd   : > { %560 = vlog2.f32 %v418_v57 }
 0x2d0   : > { %v421_v58 = vpop.xlane.xlu1 %420  ;;  %v424_v59 = vpop.xlane.xlu0 %423 }
 0x2d1   : > { %562 = vlog2.f32 %v421_v58 }
 0x2d2   : > { %564 = vlog2.f32 %v424_v59 }
 0x2d4   : > { %v427_v60 = vpop.xlane.xlu1 %426 }
 0x2d5   : > { %566 = vlog2.f32 %v427_v60 }
 0x2da   : > { %v561_v61 = vpop.eup %560 }
 0x2db   : > { %v429_v62 = vmul.f32 0.6931472, %v561_v61 }
 0x2dd   : > { %v436_v63 = vsub.f32 %v404_v40, %v429_v62 }
 0x2de   : > { %v563_v0 = vpop.eup %562 }
 0x2df   : > { %v565_v1 = vpop.eup %564  ;;  %440 = vst.msk [vmem:[%s226_s12] sm:$0xff] %vm391_vm2, %v436_v63  ;;  %v431_v2 = vmul.f32 0.6931472, %v563_v0 }
 0x2e0   : > { %v433_v3 = vmul.f32 0.6931472, %v565_v1 }
 0x2e1   : > { %v437_v4 = vsub.f32 %v405_v46, %v431_v2 }
 0x2e2   : > { %v567_v5 = vpop.eup %566  ;;  %v438_v6 = vsub.f32 %v406_v38, %v433_v3 }
 0x2e3   : > { %441 = vst.msk [vmem:[%s226_s12 + $0x8] sm:$0xff] %vm391_vm2, %v437_v4  ;;  %v435_v7 = vmul.f32 0.6931472, %v567_v5 }
 0x2e4   : > { %442 = vst.msk [vmem:[%s226_s12 + $0x10] sm:$0xff] %vm391_vm2, %v438_v6 }
 0x2e5   : > { %v439_v8 = vsub.f32 %v407_v44, %v435_v7 }
 0x2e7   : > { %443 = vst.msk [vmem:[%s226_s12 + $0x18] sm:$0xff] %vm391_vm2, %v439_v8 }
 0x2e8 PF: > { %s15_s18 = sadd.s32 1, %s574_s18  }
 0x2e9   : > { %p12_p4 = scmp.ge.s32.totalorder %s15_s18, 4  }
 0x2eb   :  { %14 = sbr.rel (!%p12_p4) target bundleno = 1 (0x1), region = 70 }

</bundles_post_ra>
